<compile_context>
chip_gen: v7x
topology: tpu7x:2x2x1
jax: 0.10.0
libtpu: 0.0.40
codegen_flags: <defaults>
</compile_context>

<pallas_src>
import numpy as np
import jax
import jax.numpy as jnp
from jax.experimental import pallas as pl
from jax.experimental.pallas import tpu as pltpu

_LANES = 512                             # preferred lane-dense width (mult of 128)
_MAX_BLOCK_BYTES = 2 * 1024 * 1024       # soft cap per input block (x2 in x2 bufs)
_WIDE_ROW_FALLBACK_BYTES = 4 * 1024 * 1024
_VMEM_LIMIT_BYTES = 32 * 1024 * 1024
_CORE_SPLITS = 2                         # leading 'parallel' axis (v7x megacore)


def _round_up(x: int, m: int) -> int:
    return ((x + m - 1) // m) * m


def _sublane_quantum(*dtypes) -> int:
    """Min sublane multiple for the block row dim, per dtype packing."""
    q = 8
    for d in dtypes:
        item = jnp.dtype(d).itemsize
        q = max(q, 8 * (4 // item) if item <= 4 else 8)
    return q


def _as_2d(a):
    """Free (row-major collapse) 2D view of `a` -- no HBM rewrite."""
    n = int(np.prod(a.shape))
    for c in (_LANES, 256, 128):
        if n % c == 0:
            return jnp.reshape(a, (n // c, c))
    if a.ndim >= 2:
        return jnp.reshape(a, (-1, a.shape[-1]))
    return jnp.reshape(a, (1, n))


def _make_pair_kernel(total_rows: int, tile_rows: int, steps_per_core: int):
    margin = 1.0

    def kernel(t_ref, p_ref, out_ref, acc_ref):
        c = pl.program_id(0)   # core-split axis ('parallel')
        i = pl.program_id(1)   # row-sweep axis ('arbitrary')

        @pl.when(i == 0)
        def _():
            acc_ref[...] = jnp.zeros_like(acc_ref)

        # Native-dtype load, f32 compute in-register (keeps HBM traffic at
        # source precision; compute stays f32 on the VPU -> fine on v5e too).
        x = t_ref[...].astype(jnp.float32)   # hinge "input"  (target tensor)
        y = p_ref[...].astype(jnp.float32)   # hinge "labels" (prediction tensor)
        # torch aten HingeEmbeddingLoss(reduction='none', margin=1):
        #   where(y != 1, clamp(margin - x, min=0), 0) + where(y != -1, x, 0)
        loss = (jnp.where(y != 1.0, jnp.maximum(margin - x, 0.0), 0.0)
                + jnp.where(y != -1.0, x, 0.0))

        # Mask rows past the true extent (partial last tile, and any fully
        # out-of-range step of the core split, whose index_map was clamped).
        blk = c * steps_per_core + i
        rows = jax.lax.broadcasted_iota(jnp.int32, loss.shape, 0) + blk * tile_rows
        loss = jnp.where(rows < total_rows, loss, 0.0)

        # Fold tile rows onto 8 sublanes: pure per-vreg VPU adds, no XLU.
        tr, cc = loss.shape
        acc_ref[...] += loss.reshape(tr // 8, 8, cc).sum(axis=0)

        @pl.when(i == steps_per_core - 1)
        def _():
            # One small cross-lane reduce per core, once, in the epilogue.
            out_ref[0, 0] = jnp.sum(acc_ref[...])

    return kernel


def _pair_hinge_sum_ref(t, p):
    x = t.astype(jnp.float32)
    y = p.astype(jnp.float32)
    return jnp.sum(jnp.where(y != 1.0, jnp.maximum(1.0 - x, 0.0), 0.0)
                   + jnp.where(y != -1.0, x, 0.0))


def _pair_hinge_sum(t, p, *, max_block_bytes=_MAX_BLOCK_BYTES,
                    core_splits=_CORE_SPLITS):
    """Unnormalized sum of element-wise hinge(input=t, labels=p) via Pallas."""
    assert t.shape == p.shape, "target / prediction shape mismatch"
    t2 = _as_2d(t)
    p2 = _as_2d(p)
    R, C = (int(s) for s in t2.shape)
    itemsize = max(t2.dtype.itemsize, p2.dtype.itemsize)
    sub = _sublane_quantum(t2.dtype, p2.dtype)

    if sub * C * itemsize > _WIDE_ROW_FALLBACK_BYTES:
        # TODO(synk): rows too wide to tile within the VMEM budget; fall back
        # to the fused XLA path for this (atypical) shape.
        return _pair_hinge_sum_ref(t, p)

    tile_rows = max(sub, (max_block_bytes // (C * itemsize)) // sub * sub)
    tile_rows = min(tile_rows, _round_up(R, sub))
    num_blocks = -(-R // tile_rows)
    ncore = max(1, min(core_splits, num_blocks))
    steps = -(-num_blocks // ncore)

    def in_map(c, i):
        # Clamp so a core's trailing (fully out-of-range) step re-reads the
        # last valid block instead of issuing an OOB DMA; the kernel's row
        # mask (computed from the *logical* block index) zeroes it out.
        return (jnp.minimum(c * steps + i, num_blocks - 1), 0)

    n = R * C
    out = pl.pallas_call(
        _make_pair_kernel(R, tile_rows, steps),
        out_shape=jax.ShapeDtypeStruct((ncore, 1), jnp.float32),
        grid_spec=pltpu.PrefetchScalarGridSpec(
            num_scalar_prefetch=0,
            grid=(ncore, steps),
            in_specs=[
                pl.BlockSpec((tile_rows, C), in_map),
                pl.BlockSpec((tile_rows, C), in_map),
            ],
            out_specs=pl.BlockSpec((1, 1), lambda c, i: (c, 0),
                                   memory_space=pltpu.SMEM),
            scratch_shapes=[pltpu.VMEM((8, C), jnp.float32)],
        ),
        compiler_params=pltpu.CompilerParams(
            dimension_semantics=("parallel", "arbitrary"),
            vmem_limit_bytes=_VMEM_LIMIT_BYTES),
        cost_estimate=pl.CostEstimate(
            flops=6 * n,
            transcendentals=0,
            bytes_accessed=(t2.size * t2.dtype.itemsize
                            + p2.size * p2.dtype.itemsize + 4 * ncore)),
    )(t2, p2)
    return jnp.sum(out)


def jepa_hinge_loss(t_list, p_list, data_shape, *,
                    max_block_bytes=_MAX_BLOCK_BYTES, core_splits=_CORE_SPLITS):
    """sum_k sum_elems hinge(target_k, pred_k) / (B * prod(data_shape))."""
    batch = t_list[0].shape[0]
    denom = float(batch) * float(np.prod(data_shape))
    total = jnp.float32(0.0)
    for t, p in zip(t_list, p_list):
        total = total + _pair_hinge_sum(t, p, max_block_bytes=max_block_bytes,
                                        core_splits=core_splits)
    return total / jnp.float32(denom)


def _hinge_loss_ref(t_list, p_list, data_shape):
    """Pure-JAX reference of the torch semantics (also the small-input path)."""
    batch = t_list[0].shape[0]
    denom = float(batch) * float(np.prod(data_shape))
    total = jnp.float32(0.0)
    for t, p in zip(t_list, p_list):
        total = total + _pair_hinge_sum_ref(t, p)
    return total / jnp.float32(denom)


class JEPALossPallas:
    """JAX/Pallas port of JEPALoss (custom hinge latent-loss path)."""

    def __init__(self, loss_definition, data_shape, min_pallas_elements=1 << 20):
        for loss in loss_definition:
            assert isinstance(loss, dict)
            assert 'name' in loss, 'name is required in loss definition'
            assert 'in_keys' in loss, 'in_keys are required in loss definition'
            assert 'type' in loss, 'type is required in loss definition'
            assert 'weight' in loss, 'weight is required in loss definition'
        self.loss_definition = loss_definition
        self.data_shape = data_shape
        # Below this total element count, pallas_call launch/grid overhead
        # dwarfs the work -> use the fused pure-JAX path instead.
        self.min_pallas_elements = min_pallas_elements

    def __call__(self, computed, *, targets=None, distributions=None, step_n=None):
        # TODO(synk): params.reconstruction_loss / params.kl_divergence /
        # gamma & kldiv schedules depend on an external global `params` object;
        # assumed disabled (None) here, so targets/distributions/step_n are unused.
        losses = {'loss': jnp.float32(0.0)}
        for loss_def in self.loss_definition:
            # TODO(synk): only the documented 'hinge' jepa_latent loss type is
            # implemented (l1/mse/ce/bce unused by this config).
            assert loss_def['type'] == 'hinge'
            name = loss_def['name']
            prediction_key = loss_def['in_keys'][0]
            target_key = loss_def['in_keys'][1]
            weight = loss_def['weight']

            t_list, p_list = [], []
            for key, value in computed.items():
                if key.endswith(target_key):
                    t_list.append(value)
                    p_list.append(computed[key[:-len(target_key)] + prediction_key])

            total_elems = sum(int(np.prod(t.shape)) for t in t_list)
            if total_elems >= self.min_pallas_elements:
                val = jepa_hinge_loss(t_list, p_list, self.data_shape)
            else:
                val = _hinge_loss_ref(t_list, p_list, self.data_shape)
            losses[name] = val
            losses['loss'] = losses['loss'] + weight * val
        return losses


if __name__ == "__main__":
    key = jax.random.PRNGKey(0)
    B, D = 2, 32
    data_shape = (4, 16, 16)

    k1, k2, k3, k4 = jax.random.split(key, 4)
    computed = {
        "enc_manifold_state_target": jax.random.normal(k1, (B, D), jnp.float32),
        "enc_manifold_belief": jnp.where(jax.random.bernoulli(k2, 0.5, (B, D)), 1.0, -1.0),
        "dec_manifold_state_target": jax.random.normal(k3, (B, D), jnp.float32),
        "dec_manifold_belief": jnp.where(jax.random.bernoulli(k4, 0.5, (B, D)), 1.0, -1.0),
    }

    loss_definition = [{
        "name": "jepa_latent",
        "in_keys": ["manifold_belief", "manifold_state_target"],
        "type": "hinge",
        "weight": 1.0,
    }]

    # Force the Pallas path even at this tiny size so the kernel is exercised.
    module = JEPALossPallas(loss_definition, data_shape, min_pallas_elements=0)
    losses = module(computed)
    jax.block_until_ready(losses["loss"])

    t_list = [computed["enc_manifold_state_target"],
              computed["dec_manifold_state_target"]]
    p_list = [computed["enc_manifold_belief"],
              computed["dec_manifold_belief"]]
    ref = _hinge_loss_ref(t_list, p_list, data_shape)
    assert np.allclose(np.asarray(losses["jepa_latent"]), np.asarray(ref),
                       rtol=1e-5, atol=1e-6)
    assert np.allclose(np.asarray(losses["loss"]), np.asarray(ref),
                       rtol=1e-5, atol=1e-6)

    # Check 2: bf16 sources (16-sublane quantum, in-kernel cast), with small
    # blocks so the core-split axis and multi-step accumulation are exercised.
    kb1, kb2 = jax.random.split(jax.random.PRNGKey(1))
    tb = jax.random.normal(kb1, (8, 8192), jnp.bfloat16)
    pb = jnp.where(jax.random.bernoulli(kb2, 0.5, (8, 8192)),
                   1.0, -1.0).astype(jnp.bfloat16)
    got = jepa_hinge_loss([tb], [pb], data_shape, max_block_bytes=16 * 1024)
    want = _hinge_loss_ref([tb], [pb], data_shape)
    jax.block_until_ready(got)
    assert np.allclose(np.asarray(got), np.asarray(want), rtol=1e-4, atol=1e-4)

    # Check 3: ragged f32 shape (rows not a multiple of the tile, lane dim not
    # a multiple of 128) -> partial-tile row masking, clamped trailing block
    # of the core split, and multi-step per-core accumulation.
    kc1, kc2 = jax.random.split(jax.random.PRNGKey(2))
    tc = jax.random.normal(kc1, (2, 37, 7), jnp.float32)
    pc = jnp.where(jax.random.bernoulli(kc2, 0.5, (2, 37, 7)), 1.0, -1.0)
    got = jepa_hinge_loss([tc], [pc], data_shape, max_block_bytes=1024)
    want = _hinge_loss_ref([tc], [pc], data_shape)
    jax.block_until_ready(got)
    assert np.allclose(np.asarray(got), np.asarray(want), rtol=1e-5, atol=1e-6)

    print("KERNEL_OK")
</pallas_src>

<mosaic_0001>
module attributes {stable_mosaic.version = 11 : i64} {
  func.func @kernel(%arg0: i32, %arg1: i32, %arg2: memref<8x32xf32, #tpu.memory_space<vmem>>, %arg3: memref<8x32xf32, #tpu.memory_space<vmem>>, %arg4: memref<1x1xf32, #tpu.memory_space<smem>>, %arg5: memref<8x32xf32, #tpu.memory_space<vmem>>) attributes {dimension_semantics = [#tpu.dimension_semantics<parallel>, #tpu.dimension_semantics<arbitrary>], iteration_bounds = array<i64: 1, 1>, scalar_prefetch = 0 : i64, scratch_operands = 1 : i64, tpu.core_type = #tpu.core_type<tc>, window_params = [{transform_indices = @transform_0, window_bounds = array<i64: 8, 32>}, {transform_indices = @transform_1, window_bounds = array<i64: 8, 32>}, {transform_indices = @transform_2, window_bounds = array<i64: 1, 1>}]} {
    %c0_i32 = arith.constant 0 : i32
    %0 = arith.cmpi eq, %arg1, %c0_i32 : i32
    %1 = arith.extui %0 : i1 to i32
    %c0_i32_0 = arith.constant 0 : i32
    %2 = arith.cmpi ne, %1, %c0_i32_0 : i32
    scf.if %2 {
      %cst_17 = arith.constant 0.000000e+00 : f32
      %36 = vector.broadcast %cst_17 : f32 to vector<8x32xf32>
      %c0_18 = arith.constant 0 : index
      %c0_19 = arith.constant 0 : index
      %37 = vector.load %arg5[%c0_18, %c0_19] : memref<8x32xf32, #tpu.memory_space<vmem>>, vector<8x32xf32>
      tpu.vector_store %arg5[%c0_18, %c0_19], %36 {strides = array<i32>} : memref<8x32xf32, #tpu.memory_space<vmem>>, vector<8x32xf32>,
    } else {
    }
    %c0 = arith.constant 0 : index
    %c0_1 = arith.constant 0 : index
    %3 = vector.load %arg2[%c0, %c0_1] : memref<8x32xf32, #tpu.memory_space<vmem>>, vector<8x32xf32>
    %c0_2 = arith.constant 0 : index
    %c0_3 = arith.constant 0 : index
    %4 = vector.load %arg3[%c0_2, %c0_3] : memref<8x32xf32, #tpu.memory_space<vmem>>, vector<8x32xf32>
    %cst = arith.constant 1.000000e+00 : f32
    %5 = vector.broadcast %cst : f32 to vector<8x32xf32>
    %6 = arith.cmpf one, %4, %5 : vector<8x32xf32>
    %cst_4 = arith.constant 1.000000e+00 : f32
    %7 = vector.broadcast %cst_4 : f32 to vector<8x32xf32>
    %8 = arith.subf %7, %3 : vector<8x32xf32>
    %cst_5 = arith.constant 0.000000e+00 : f32
    %9 = vector.broadcast %cst_5 : f32 to vector<8x32xf32>
    %10 = arith.maximumf %8, %9 : vector<8x32xf32>
    %cst_6 = arith.constant 0.000000e+00 : f32
    %11 = vector.broadcast %cst_6 : f32 to vector<8x32xf32>
    %12 = arith.select %6, %10, %11 : vector<8x32xi1>, vector<8x32xf32>
    %cst_7 = arith.constant -1.000000e+00 : f32
    %13 = vector.broadcast %cst_7 : f32 to vector<8x32xf32>
    %14 = arith.cmpf one, %4, %13 : vector<8x32xf32>
    %cst_8 = arith.constant 0.000000e+00 : f32
    %15 = vector.broadcast %cst_8 : f32 to vector<8x32xf32>
    %16 = arith.select %14, %3, %15 : vector<8x32xi1>, vector<8x32xf32>
    %17 = arith.addf %12, %16 : vector<8x32xf32>
    %c1_i32 = arith.constant 1 : i32
    %18 = arith.muli %arg0, %c1_i32 : i32
    %19 = arith.addi %18, %arg1 : i32
    %20 = tpu.iota {dimensions = array<i32: 0>} : vector<8x32xi32>
    %c8_i32 = arith.constant 8 : i32
    %21 = arith.muli %19, %c8_i32 : i32
    %22 = vector.broadcast %21 : i32 to vector<8x32xi32>
    %23 = arith.addi %20, %22 : vector<8x32xi32>
    %c2_i32 = arith.constant 2 : i32
    %24 = vector.broadcast %c2_i32 : i32 to vector<8x32xi32>
    %25 = arith.cmpi slt, %23, %24 : vector<8x32xi32>
    %cst_9 = arith.constant 0.000000e+00 : f32
    %26 = vector.broadcast %cst_9 : f32 to vector<8x32xf32>
    %27 = arith.select %25, %17, %26 : vector<8x32xi1>, vector<8x32xf32>
    %c0_10 = arith.constant 0 : index
    %c0_11 = arith.constant 0 : index
    %28 = vector.load %arg5[%c0_10, %c0_11] : memref<8x32xf32, #tpu.memory_space<vmem>>, vector<8x32xf32>
    %29 = vector.shape_cast %27 : vector<8x32xf32> to vector<1x8x32xf32>
    %cst_12 = arith.constant dense<0.000000e+00> : vector<8x32xf32>
    %30 = vector.multi_reduction <add>, %29, %cst_12 [0] : vector<1x8x32xf32> to vector<8x32xf32>
    %31 = arith.addf %28, %30 : vector<8x32xf32>
    %c0_13 = arith.constant 0 : index
    %c0_14 = arith.constant 0 : index
    %32 = vector.load %arg5[%c0_13, %c0_14] : memref<8x32xf32, #tpu.memory_space<vmem>>, vector<8x32xf32>
    tpu.vector_store %arg5[%c0_13, %c0_14], %31 {strides = array<i32>} : memref<8x32xf32, #tpu.memory_space<vmem>>, vector<8x32xf32>,
    %c0_i32_15 = arith.constant 0 : i32
    %33 = arith.cmpi eq, %arg1, %c0_i32_15 : i32
    %34 = arith.extui %33 : i1 to i32
    %c0_i32_16 = arith.constant 0 : i32
    %35 = arith.cmpi ne, %34, %c0_i32_16 : i32
    scf.if %35 {
      %c0_17 = arith.constant 0 : index
      %c0_18 = arith.constant 0 : index
      %36 = vector.load %arg5[%c0_17, %c0_18] : memref<8x32xf32, #tpu.memory_space<vmem>>, vector<8x32xf32>
      %37 = vector.shape_cast %36 : vector<8x32xf32> to vector<1x8x32xf32>
      %cst_19 = arith.constant dense<0.000000e+00> : vector<1xf32>
      %38 = vector.multi_reduction <add>, %37, %cst_19 [1, 2] : vector<1x8x32xf32> to vector<1xf32>
      %39 = vector.shape_cast %38 : vector<1xf32> to vector<1x1x1xf32>
      %40 = vector.extract %39[0, 0, 0] : f32 from vector<1x1x1xf32>
      %c0_20 = arith.constant 0 : index
      %c0_21 = arith.constant 0 : index
      %41 = memref.load %arg4[%c0_20, %c0_21] : memref<1x1xf32, #tpu.memory_space<smem>>
      memref.store %40, %arg4[%c0_20, %c0_21] : memref<1x1xf32, #tpu.memory_space<smem>>
    } else {
    }
    return
  }
  func.func @transform_0(%arg0: i32, %arg1: i32) -> (i32, i32) {
    %c1_i32 = arith.constant 1 : i32
    %0 = arith.muli %arg0, %c1_i32 : i32
    %1 = arith.addi %0, %arg1 : i32
    %c0_i32 = arith.constant 0 : i32
    %2 = arith.minsi %1, %c0_i32 : i32
    %c0_i32_0 = arith.constant 0 : i32
    %c0_i32_1 = arith.constant 0 : i32
    return %2, %c0_i32_0 : i32, i32
  }
  func.func @transform_1(%arg0: i32, %arg1: i32) -> (i32, i32) {
    %c1_i32 = arith.constant 1 : i32
    %0 = arith.muli %arg0, %c1_i32 : i32
    %1 = arith.addi %0, %arg1 : i32
    %c0_i32 = arith.constant 0 : i32
    %2 = arith.minsi %1, %c0_i32 : i32
    %c0_i32_0 = arith.constant 0 : i32
    %c0_i32_1 = arith.constant 0 : i32
    return %2, %c0_i32_0 : i32, i32
  }
  func.func @transform_2(%arg0: i32, %arg1: i32) -> (i32, i32) {
    %c0_i32 = arith.constant 0 : i32
    %c0_i32_0 = arith.constant 0 : i32
    return %arg0, %c0_i32 : i32, i32
  }
}

</mosaic_0001>

<bundles_post_ra>
// kernel: tpu_custom_call.1
= control target key start
LH: loop header
LB: loop body
LE: loop exit
PB: predicated region body
PF: predicated region fallthrough
CT: control target
= control target key end

     0   :  { %7 = vsyncpa [#allocation4], 0  ;;  %s243_s0 = inlined_call_operand.hbm [shape: f32[2,32], index: 0, kind: input, shape index: {}]   ;;  %s244_s1 = inlined_call_operand.vmem [shape: f32[2,32], index: 1, kind: input, shape index: {}]   ;;  %s245_s2 = inlined_call_operand.hbm [shape: f32[1,1], index: 2, kind: output, shape index: {}]  }
   0x1   :  { %8 = vsyncpa [#allocation5], 0 }
   0x2   :  { %19 = vsyncadd [#allocation4], 96  ;;  %s193_s9 = smov [#allocation3]   ;;  %s157_s13 = scalar_lea.hbm %s243_s0, 32 }
   0x3   :  { %s24_s10 = sshll.u32 %s193_s9, 4  ;;  %p158_p0 = scmp.ne.s32.totalorder %s243_s0, %s157_s13  ;;  %s25_s10 = int_to_ptr.vmem [resolvable:$true] %s24_s10 }
   0x4   :  { %p161_p1 = scmp.lt.u32.totalorder %s157_s13, %s243_s0 }
   0x6   :  { %p163_p2 = pnand %p161_p1, %p158_p0 }
   0x8   :  { %166 = shalt.err (!%p163_p2)
}
   0x9   :  { %s167_s18 = scalar_lea.vmem %s25_s10, 32  ;;  %s171_s19 = scalar_lea.vmem %s25_s10, 128 }
   0xa   :  { %p168_p3 = scmp.ne.s32.totalorder %s25_s10, %s167_s18  ;;  %p172_p4 = scmp.lt.s32.totalorder %s25_s10, %s25_s10 }
   0xb   :  { %p173_p5 = scmp.lt.s32.totalorder %s171_s19, %s167_s18 }
   0xd   :  { %p174_p6 = por %p173_p5, %p172_p4 }
   0xf   :  { %p175_p7 = pnand %p174_p6, %p168_p3 }
  0x11   :  { %178 = shalt.err (!%p175_p7)
}
  0x12   :  { %s194_s20 = smov 32   ;;  %s195_s21 = smov 2  }
  0x13   :  { %30 = dma.hbm_to_vmem [thread:$0]  %s243_s0, 32, %s25_s10, [#allocation4], %s194_s20, %s194_s20, %s195_s21  }
  0x14   :  { %189 = dma.done.wait [#allocation4], 128  }
  0x15   :  { %190 = vsyncadd [#allocation4], 4294967168  ;;  %vm88_vm0 = vcmask 261120   ;;  %v196_v0 = vmov 0.0   ;;  %v100_v1 = vlaneseq  ;;  %v90_v2 = vld [vmem:[#allocation3] sm:$0xff]  ;;  %v91_v3 = vld [vmem:[%s244_s1] sm:$0xff] }
  0x16   :  { %89 = vst.msk [vmem:[#allocation2] sm:$0xff] %vm88_vm0, %v196_v0  ;;  %v93_v4 = vsub.f32 1.0, %v90_v2  ;;  %vm96_vm1 = vcmp.ne.f32.partialorder %v91_v3, -1.0  ;;  %vm92_vm2 = vcmp.ne.f32.partialorder %v91_v3, 1.0  ;;  %s179_s27 = scalar_lea.hbm %s245_s2, 16 }
  0x17   :  { %v101_v5 = vshrl.u32 %v100_v1, 7  ;;  %v97_v7 = vsel %vm96_vm1, %v90_v2, 0.0  ;;  %p180_p8 = scmp.ne.s32.totalorder %s245_s2, %s179_s27  ;;  %p183_p9 = scmp.lt.u32.totalorder %s179_s27, %s245_s2 }
  0x18   :  { %v94_v6 = vmax.f32 %v93_v4, 0.0 }
  0x19   :  { %vm105_vm3 = vcmp.lt.s32.totalorder %v101_v5, 2  ;;  %p185_p10 = pnand %p183_p9, %p180_p8 }
  0x1a   :  { %v95_v8 = vsel %vm92_vm2, %v94_v6, 0.0 }
  0x1b   :  { %v98_v9 = vadd.f32 %v97_v7, %v95_v8 }
  0x1d   :  { %v107_v10 = vld [vmem:[#allocation2] sm:$0xff]  ;;  %v106_v11 = vsel %vm105_vm3, %v98_v9, 0.0 }
  0x1e   :  { %v109_v12 = vadd.f32 %v107_v10, %v106_v11 }
  0x20   :  { %111 = vst.msk [vmem:[#allocation2] sm:$0xff] %vm88_vm0, %v109_v12 }
  0x27   :  { %v115_v13 = vld [vmem:[#allocation2] sm:$0xff] }
  0x28   :  { %v116_v14 = vsel %vm88_vm0, %v115_v13, 0.0 }
  0x29   :  { %117 = vadd.xlane.f32.xlu0 %v116_v14 }
  0xb6   :  { %v118_v15 = vpop.xlane.xlu0 %117 }
  0xb7   :  { %v119_v16 = vrot.slane %v118_v15, 4 }
  0xb9   :  { %v120_v17 = vadd.f32 %v119_v16, %v118_v15 }
  0xbb   :  { %v121_v18 = vrot.slane %v120_v17, 2 }
  0xbd   :  { %v122_v19 = vadd.f32 %v121_v18, %v120_v17 }
  0xbf   :  { %v123_v20 = vrot.slane %v122_v19, 1 }
  0xc1   :  { %v124_v21 = vadd.f32 %v123_v20, %v122_v19 }
  0xc3   :  { %150 = vpush %v124_v21 }
  0xf4   :  { %s151_s0 = spop %150 }
  0xf5   :  { %127 = sst [smem:[#allocation6]] %s151_s0 }
  0xf6   :  { %188 = shalt.err (!%p185_p10)
}
  0xf7   :  { %s197_s4 = smov [#allocation6]  }
  0xf8   :  { %135 = dma.smem_to_hbm %s197_s4, 16, %s245_s2, [#allocation5]  }
  0xf9   :  { %191 = dma.done.wait [#allocation5], 16  }
  0xfa   :  { %192 = vsyncadd [#allocation5], 4294967280 }
  0xfb   :  { %139 = sfence }
  0xfc   :  { %140 = vsyncpa [#allocation4], 1 }
  0xfd   :  { %141 = vsyncpa [#allocation5], 1 }

</bundles_post_ra>
